<compile_context>
chip_gen: v6e
topology: v6e:2x2x1
jax: 0.10.0
libtpu: 0.0.40
codegen_flags: <defaults>
</compile_context>

<pallas_src>
import jax
import jax.numpy as jnp
from jax.experimental import pallas as pl
from jax.experimental.pallas import tpu as pltpu


def _film_kernel(z_ref, w_ref, b_ref, out_ref):
    # (tm, Z) @ (Z, 2C) + (1, 2C) -> (tm, 2C).  MXU matmul, f32 accumulate.
    acc = jnp.dot(z_ref[...], w_ref[...], preferred_element_type=jnp.float32)
    out_ref[...] = (acc + b_ref[...]).astype(out_ref.dtype)


def film_forward(z: jax.Array, w: jax.Array, b: jax.Array,
                 *, row_tile: int = 256) -> jax.Array:
    """z: (B, z_dim), w: (z_dim, 2*C), b: (2*C,) -> (B, 2*C)."""
    B, Z = z.shape
    Z2, O = w.shape
    assert Z == Z2 and b.shape == (O,)
    b2d = b.reshape(1, O)

    if B <= row_tile:
        # Small batch (the common FiLM case): single invocation, no grid.
        # Whole arrays live in VMEM; no pipeline bookkeeping, no double
        # buffering — the kernel is just one matmul + bias add + store.
        return pl.pallas_call(
            _film_kernel,
            out_shape=jax.ShapeDtypeStruct((B, O), z.dtype),
            in_specs=[
                pl.BlockSpec(memory_space=pltpu.MemorySpace.VMEM),
                pl.BlockSpec(memory_space=pltpu.MemorySpace.VMEM),
                pl.BlockSpec(memory_space=pltpu.MemorySpace.VMEM),
            ],
            out_specs=pl.BlockSpec(memory_space=pltpu.MemorySpace.VMEM),
        )(z, w, b2d)

    # Large batch: tile rows of z / out.  Weights and bias are tiny, so they
    # stay resident (index_map always returns block (0, 0)).  The row axis is
    # independent work -> "parallel" (shards across the 2 TCs on v7x).
    n_blocks = pl.cdiv(B, row_tile)
    B_pad = n_blocks * row_tile
    z_p = jnp.pad(z, ((0, B_pad - B), (0, 0))) if B_pad != B else z

    out = pl.pallas_call(
        _film_kernel,
        out_shape=jax.ShapeDtypeStruct((B_pad, O), z.dtype),
        grid=(n_blocks,),
        in_specs=[
            pl.BlockSpec((row_tile, Z), lambda i: (i, 0)),
            pl.BlockSpec((Z, O), lambda i: (0, 0)),
            pl.BlockSpec((1, O), lambda i: (0, 0)),
        ],
        out_specs=pl.BlockSpec((row_tile, O), lambda i: (i, 0)),
        compiler_params=pltpu.CompilerParams(
            dimension_semantics=("parallel",),
        ),
    )(z_p, w, b2d)
    return out[:B] if B_pad != B else out


if __name__ == "__main__":
    key = jax.random.PRNGKey(0)

    # --- Case 1: FiLM's real shapes (small-batch, no-grid path) -----------
    B, Z_DIM, NUM_CHANNELS = 2, 8, 4
    OUT = 2 * NUM_CHANNELS
    k_z, k_w, k_b, k2 = jax.random.split(key, 4)

    # Deterministic nn.Linear-style init: U(-1/sqrt(in), 1/sqrt(in)).
    bound = 1.0 / (Z_DIM ** 0.5)
    w = jax.random.uniform(k_w, (Z_DIM, OUT), jnp.float32, -bound, bound)
    b = jax.random.uniform(k_b, (OUT,), jnp.float32, -bound, bound)
    z = jax.random.normal(k_z, (B, Z_DIM), jnp.float32)

    out = film_forward(z, w, b)
    jax.block_until_ready(out)
    ref = z @ w + b
    assert out.shape == (B, OUT)
    assert jnp.allclose(out, ref, atol=1e-5, rtol=1e-5)

    # --- Case 2: large-batch path (grid over rows, weights resident) ------
    B2, Z2_DIM, C2 = 1000, 32, 64          # B2 not a tile multiple: exercises padding
    OUT2 = 2 * C2
    k_z2, k_w2, k_b2 = jax.random.split(k2, 3)
    bound2 = 1.0 / (Z2_DIM ** 0.5)
    w2 = jax.random.uniform(k_w2, (Z2_DIM, OUT2), jnp.float32, -bound2, bound2)
    b2 = jax.random.uniform(k_b2, (OUT2,), jnp.float32, -bound2, bound2)
    z2 = jax.random.normal(k_z2, (B2, Z2_DIM), jnp.float32)

    out2 = film_forward(z2, w2, b2)
    jax.block_until_ready(out2)
    ref2 = z2 @ w2 + b2
    assert out2.shape == (B2, OUT2)
    assert jnp.allclose(out2, ref2, atol=1e-4, rtol=1e-4)

    print("KERNEL_OK")
</pallas_src>

<mosaic_0001>
module attributes {stable_mosaic.version = 11 : i64} {
  func.func @_film_kernel(%arg0: memref<2x8xf32, #tpu.memory_space<vmem>>, %arg1: memref<8x8xf32, #tpu.memory_space<vmem>>, %arg2: memref<1x8xf32, #tpu.memory_space<vmem>>, %arg3: memref<2x8xf32, #tpu.memory_space<vmem>>) attributes {dimension_semantics = [], scalar_prefetch = 0 : i64, scratch_operands = 0 : i64, tpu.core_type = #tpu.core_type<tc>} {
    %c0 = arith.constant 0 : index
    %c0_0 = arith.constant 0 : index
    %0 = vector.load %arg0[%c0, %c0_0] : memref<2x8xf32, #tpu.memory_space<vmem>>, vector<2x8xf32>
    %c0_1 = arith.constant 0 : index
    %c0_2 = arith.constant 0 : index
    %1 = vector.load %arg1[%c0_1, %c0_2] : memref<8x8xf32, #tpu.memory_space<vmem>>, vector<8x8xf32>
    %cst = arith.constant dense<0.000000e+00> : vector<2x8xf32>
    %2 = tpu.matmul %0, %1, %cst {dimension_numbers = #tpu.dot_dimension_numbers<[1], [0], [0], [1], [0, 0, 1, 1], [], []>} : vector<2x8xf32>, vector<8x8xf32>, vector<2x8xf32> -> vector<2x8xf32>
    %c0_3 = arith.constant 0 : index
    %c0_4 = arith.constant 0 : index
    %3 = vector.load %arg2[%c0_3, %c0_4] : memref<1x8xf32, #tpu.memory_space<vmem>>, vector<1x8xf32>
    %4 = vector.broadcast %3 : vector<1x8xf32> to vector<2x8xf32>
    %5 = arith.addf %2, %4 : vector<2x8xf32>
    %c0_5 = arith.constant 0 : index
    %c0_6 = arith.constant 0 : index
    %6 = vector.load %arg3[%c0_5, %c0_6] : memref<2x8xf32, #tpu.memory_space<vmem>>, vector<2x8xf32>
    tpu.vector_store %arg3[%c0_5, %c0_6], %5 {strides = array<i32>} : memref<2x8xf32, #tpu.memory_space<vmem>>, vector<2x8xf32>,
    return
  }
}

</mosaic_0001>

<bundles_post_ra>
// kernel: tpu_custom_call.1
= control target key start
LH: loop header
LB: loop body
LE: loop exit
PB: predicated region body
PF: predicated region fallthrough
CT: control target
= control target key end

     0   :  { %8 = vsyncpa [#allocation3], 0  ;;  %s257_s0 = inlined_call_operand.hbm [shape: f32[2,8], index: 0, kind: input, shape index: {}]   ;;  %s258_s1 = inlined_call_operand.hbm [shape: f32[8,8], index: 1, kind: input, shape index: {}]   ;;  %s259_s2 = inlined_call_operand.vmem [shape: f32[1,8], index: 2, kind: input, shape index: {}]   ;;  %s260_s3 = inlined_call_operand.hbm [shape: f32[2,8], index: 3, kind: output, shape index: {}]  }
   0x1   :  { %9 = vsyncpa [#allocation6], 0 }
   0x2   :  { %10 = vsyncpa [#allocation4], 0  ;;  %s220_s12 = smov [#allocation2]   ;;  %s221_s14 = smov [#allocation5]  }
   0x3   :  { %s17_s13 = sshll.u32 %s220_s12, 4  ;;  %s27_s15 = sshll.u32 %s221_s14, 4  ;;  %s18_s13 = int_to_ptr.vmem [resolvable:$true] %s17_s13  ;;  %s28_s15 = int_to_ptr.vmem [resolvable:$true] %s27_s15 }
   0x4   :  { %s162_s16 = scalar_lea.vmem %s18_s13, 32  ;;  %p167_p1 = scmp.lt.s32.totalorder %s18_s13, %s18_s13 }
   0x5   :  { %p163_p0 = scmp.ne.s32.totalorder %s18_s13, %s162_s16  ;;  %p168_p2 = scmp.lt.s32.totalorder %s162_s16, %s162_s16 }
   0x7   :  { %p169_p3 = por %p168_p2, %p167_p1 }
   0x9   :  { %p170_p4 = pnand %p169_p3, %p163_p0 }
   0xb   :  { %173 = shalt.err (!%p170_p4)
}
   0xc   :  { %20 = dma.hbm_to_vmem [thread:$0]  %s257_s0, 32, %s18_s13, [#allocation3]  }
   0xd   :  { %s182_s19 = scalar_lea.vmem %s28_s15, 128  ;;  %p187_p6 = scmp.lt.s32.totalorder %s28_s15, %s28_s15 }
   0xe   :  { %p183_p5 = scmp.ne.s32.totalorder %s28_s15, %s182_s19  ;;  %p188_p7 = scmp.lt.s32.totalorder %s182_s19, %s182_s19 }
  0x10   :  { %p189_p8 = por %p188_p7, %p187_p6 }
  0x12   :  { %p190_p9 = pnand %p189_p8, %p183_p5 }
  0x14   :  { %193 = shalt.err (!%p190_p9)
}
  0x15   :  { %30 = dma.hbm_to_vmem [thread:$0]  %s258_s1, 128, %s28_s15, [#allocation6]  }
  0x16   :  { %214 = dma.done.wait [#allocation3], 32  }
  0x17   :  { %215 = vsyncadd [#allocation3], 4294967264 }
  0x18   :  { %216 = dma.done.wait [#allocation6], 128  }
  0x19   :  { %217 = vsyncadd [#allocation6], 4294967168  ;;  %v222_v0 = vmov 0.0   ;;  %vm223_vm0 = vmmov 0   ;;  %vm48_vm1 = vcmask 64512   ;;  %v40_v1 = vld [vmem:[#allocation5] sm:$0xff] }
  0x1a   :  { %144 = vmatprep.subr.mxu0 %v222_v0  ;;  %146 = vmatprep.mubr.msk.f32.mxu0 %vm223_vm0, %v222_v0  ;;  %v39_v2 = vld [vmem:[#allocation2] sm:$0x3]  ;;  %s224_s23 = smov [#allocation7]   ;;  %vm122_vm2 = vcmask 58368  }
  0x1b   :  { %145 = vmatpush3.msra.mxu0 %v40_v1  ;;  %v140_v3 = vld [vmem:[%s259_s2] ss:$0 sm:$0xff]  ;;  %s130_s24 = sshll.u32 %s224_s23, 4  ;;  %s131_s24 = int_to_ptr.vmem [resolvable:$true] %s130_s24 }
  0x1c   :  { %147 = vmatmul.mubr.msk.f32.vlgmr.msra.gmra.mxu0 %vm48_vm1, %v39_v2  ;;  %s194_s1 = scalar_lea.vmem %s131_s24, 32  ;;  %p199_p11 = scmp.lt.s32.totalorder %s131_s24, %s131_s24 }
  0x1d   :  { %p195_p10 = scmp.ne.s32.totalorder %s131_s24, %s194_s1  ;;  %p200_p12 = scmp.lt.s32.totalorder %s194_s1, %s194_s1 }
  0x1f   :  { %p201_p13 = por %p200_p12, %p199_p11 }
  0x21   :  { %p202_p0 = pnand %p201_p13, %p195_p10 }
  0xdc   :  { %v118_v4 = vpop.f32.mrf.mxu0 }
  0xdd   :  { %v119_v5 = vadd.f32 %v140_v3, %v118_v4 }
  0xde   :  { %v148_v6 = vpop.f32.mrf.mxu0 }
  0xdf   :  { %123 = vst.msk [vmem:[#allocation7] sm:$0x3] %vm122_vm2, %v119_v5 }
  0xe0   :  { %205 = shalt.err (!%p202_p0)
}
  0xe1   :  { %133 = dma.vmem_to_hbm [thread:$0]  %s131_s24, 32, %s260_s3, [#allocation4]  }
  0xe2   :  { %218 = dma.done.wait [#allocation4], 32  }
  0xe3   :  { %219 = vsyncadd [#allocation4], 4294967264 }
  0xe4   :  { %137 = vsyncpa [#allocation3], 1 }
  0xe5   :  { %138 = vsyncpa [#allocation6], 1 }
  0xe6   :  { %139 = vsyncpa [#allocation4], 1 }

</bundles_post_ra>
